<compile_context>
chip_gen: v6e
topology: v6e:2x2x1
jax: 0.10.0
libtpu: 0.0.40
codegen_flags: <defaults>
</compile_context>

<pallas_src>
import jax
import jax.numpy as jnp
from jax.experimental import pallas as pl
from jax.experimental.pallas import tpu as pltpu

IN_FEATURES = 10
HIDDEN = 10
OUT_FEATURES = 10

LANE = 128                      # TPU lane width
SUBLANE_PAD = 16                # feature dim 10 pads to 16 sublanes (f32)
TB_MAX = 32768                  # batch-tile cap (lanes); ~2 MiB per array per step
VMEM_LIMIT_BYTES = 48 << 20     # fits v5e/v6e (128 MiB phys) and v7x (64 MiB phys)


def mein_netz_kernel(xT_ref, w1_ref, b1_ref, w2_ref, b2_ref, oT_ref):
    # xT_ref: (F_in, TB)  -- batch in lanes (lane-dense), features in sublanes.
    # w1_ref/w2_ref: (F_out, F_in) -- exactly the PyTorch weight layout.
    # b1_ref/b2_ref: (F_out, 1), broadcast over the lane (batch) axis.
    xT = xT_ref[...]

    # lin1: W1 @ x^T + b1, then ReLU (MXU matmul, f32 accumulate; VPU relu).
    h = jnp.dot(w1_ref[...], xT, preferred_element_type=jnp.float32)
    h = jnp.maximum(h + b1_ref[...], 0.0)

    # lin2: W2 @ h + b2
    y = jnp.dot(w2_ref[...], h, preferred_element_type=jnp.float32)
    y = y + b2_ref[...]

    # TODO(synk): optional bf16 activation I/O (upcast in-kernel) would halve
    # HBM bytes; kept f32 for exact parity with the PyTorch module.
    oT_ref[...] = y.astype(oT_ref.dtype)


def _pick_batch_tile(n):
    """Full-extent block for tiny batches; otherwise >=2 lane-aligned tiles
    (so both v7x TensorCores get grid steps), capped at TB_MAX."""
    if n <= 2 * LANE:
        return n
    half = pl.cdiv(pl.cdiv(n, 2), LANE) * LANE
    return min(TB_MAX, half)


def mein_netz_forward_t(xT, w1, b1, w2, b2):
    """Layout-native forward.

    xT: (10, N) -- features in sublanes, batch in lanes.  Returns (10, N).
    Preferred API: keeps the activation contract transposed end-to-end, so no
    HBM transpose copies and no lane-padded (N, 10) passes are ever made.
    w1/w2 are in PyTorch (out, in) layout, b1/b2 are (out,).
    """
    f_in, n = xT.shape
    assert f_in == IN_FEATURES

    b1c = b1.reshape(HIDDEN, 1)
    b2c = b2.reshape(OUT_FEATURES, 1)

    tb = _pick_batch_tile(n)
    grid = (pl.cdiv(n, tb),)

    # Real (padded) HBM traffic: x^T read + y^T write at 16 sublanes * N lanes,
    # plus the (16,128)-padded weight/bias tiles (negligible).
    cost = pl.CostEstimate(
        flops=2 * n * IN_FEATURES * HIDDEN + 2 * n * HIDDEN * OUT_FEATURES,
        transcendentals=0,
        bytes_accessed=4 * (2 * SUBLANE_PAD * n + 4 * SUBLANE_PAD * LANE),
    )

    return pl.pallas_call(
        mein_netz_kernel,
        out_shape=jax.ShapeDtypeStruct((OUT_FEATURES, n), xT.dtype),
        grid=grid,
        in_specs=[
            pl.BlockSpec((IN_FEATURES, tb), lambda i: (0, i)),          # x^T tile
            pl.BlockSpec((HIDDEN, IN_FEATURES), lambda i: (0, 0)),      # W1 (resident)
            pl.BlockSpec((HIDDEN, 1), lambda i: (0, 0)),                # b1 (resident)
            pl.BlockSpec((OUT_FEATURES, HIDDEN), lambda i: (0, 0)),     # W2 (resident)
            pl.BlockSpec((OUT_FEATURES, 1), lambda i: (0, 0)),          # b2 (resident)
        ],
        out_specs=pl.BlockSpec((OUT_FEATURES, tb), lambda i: (0, i)),   # lane-dense out
        compiler_params=pltpu.CompilerParams(
            dimension_semantics=("parallel",),
            vmem_limit_bytes=VMEM_LIMIT_BYTES,
        ),
        cost_estimate=cost,
    )(xT, w1, b1c, w2, b2c)


def mein_netz_forward(x, w1, b1, w2, b2):
    """(N, 10) -> (N, 10) compatibility wrapper matching the PyTorch contract.

    Note: the boundary transposes cost an extra HBM round trip over the
    lane-padded (N, 10) layout; inside a larger model prefer
    mein_netz_forward_t and keep activations in (10, N) across layers.
    """
    return mein_netz_forward_t(x.T, w1, b1, w2, b2).T


def init_linear_params(key, fan_in, fan_out):
    # Deterministic init mirroring nn.Linear: U(-1/sqrt(fan_in), 1/sqrt(fan_in)).
    kw, kb = jax.random.split(key)
    bound = 1.0 / jnp.sqrt(jnp.float32(fan_in))
    # Stored in the PyTorch layout (out, in); forward uses W @ x^T (== x @ W.T).
    w = jax.random.uniform(kw, (fan_out, fan_in), jnp.float32, -bound, bound)
    b = jax.random.uniform(kb, (fan_out,), jnp.float32, -bound, bound)
    return w, b


if __name__ == "__main__":
    key = jax.random.PRNGKey(0)
    k_x, k_x2, k_x3, k_l1, k_l2 = jax.random.split(key, 5)

    w1, b1 = init_linear_params(k_l1, IN_FEATURES, HIDDEN)
    w2, b2 = init_linear_params(k_l2, HIDDEN, OUT_FEATURES)

    def ref_fwd(x):
        # Exact PyTorch semantics: relu(x @ W1.T + b1) @ W2.T + b2.
        return jnp.maximum(x @ w1.T + b1, 0.0) @ w2.T + b2

    # 1) Small batch through the (N, 10) compatibility path: one full-extent block.
    batch = 8
    x = jax.random.normal(k_x, (batch, IN_FEATURES), jnp.float32)
    out = mein_netz_forward(x, w1, b1, w2, b2)
    jax.block_until_ready(out)
    assert out.shape == (batch, OUT_FEATURES)
    assert jnp.allclose(out, ref_fwd(x), atol=1e-5, rtol=1e-5)

    # 2) Layout-native path, non-multiple batch: 2-step grid + partial last tile
    #    (exercises OOB masking on the final block, per review).
    n2 = 1500
    x2T = jax.random.normal(k_x2, (IN_FEATURES, n2), jnp.float32)
    out2T = mein_netz_forward_t(x2T, w1, b1, w2, b2)
    jax.block_until_ready(out2T)
    assert out2T.shape == (OUT_FEATURES, n2)
    assert jnp.allclose(out2T.T, ref_fwd(x2T.T), atol=1e-5, rtol=1e-5)

    # 3) Layout-native path hitting the TB_MAX cap: 3 pipelined 32K-lane tiles,
    #    partial last tile, megacore-shardable "parallel" batch grid.
    n3 = 2 * TB_MAX + 464
    x3T = jax.random.normal(k_x3, (IN_FEATURES, n3), jnp.float32)
    out3T = mein_netz_forward_t(x3T, w1, b1, w2, b2)
    jax.block_until_ready(out3T)
    assert out3T.shape == (OUT_FEATURES, n3)
    assert jnp.allclose(out3T.T, ref_fwd(x3T.T), atol=1e-5, rtol=1e-5)

    print("KERNEL_OK")
</pallas_src>

<mosaic_0001>
module attributes {stable_mosaic.version = 11 : i64} {
  func.func @mein_netz_kernel(%arg0: i32, %arg1: memref<10x8xf32, #tpu.memory_space<vmem>>, %arg2: memref<10x10xf32, #tpu.memory_space<vmem>>, %arg3: memref<10x1xf32, #tpu.memory_space<vmem>>, %arg4: memref<10x10xf32, #tpu.memory_space<vmem>>, %arg5: memref<10x1xf32, #tpu.memory_space<vmem>>, %arg6: memref<10x8xf32, #tpu.memory_space<vmem>>) attributes {dimension_semantics = [#tpu.dimension_semantics<parallel>], iteration_bounds = array<i64: 1>, scalar_prefetch = 0 : i64, scratch_operands = 0 : i64, tpu.core_type = #tpu.core_type<tc>, window_params = [{transform_indices = @transform_0, window_bounds = array<i64: 10, 8>}, {pipeline_mode = #tpu.pipeline_mode<synchronous>, transform_indices = @transform_1, window_bounds = array<i64: 10, 10>}, {pipeline_mode = #tpu.pipeline_mode<synchronous>, transform_indices = @transform_2, window_bounds = array<i64: 10, 1>}, {pipeline_mode = #tpu.pipeline_mode<synchronous>, transform_indices = @transform_3, window_bounds = array<i64: 10, 10>}, {pipeline_mode = #tpu.pipeline_mode<synchronous>, transform_indices = @transform_4, window_bounds = array<i64: 10, 1>}, {transform_indices = @transform_5, window_bounds = array<i64: 10, 8>}]} {
    %c0 = arith.constant 0 : index
    %c0_0 = arith.constant 0 : index
    %0 = vector.load %arg1[%c0, %c0_0] : memref<10x8xf32, #tpu.memory_space<vmem>>, vector<10x8xf32>
    %c0_1 = arith.constant 0 : index
    %c0_2 = arith.constant 0 : index
    %1 = vector.load %arg2[%c0_1, %c0_2] : memref<10x10xf32, #tpu.memory_space<vmem>>, vector<10x10xf32>
    %cst = arith.constant dense<0.000000e+00> : vector<10x8xf32>
    %2 = tpu.matmul %1, %0, %cst {dimension_numbers = #tpu.dot_dimension_numbers<[1], [0], [0], [1], [0, 0, 1, 1], [], []>} : vector<10x10xf32>, vector<10x8xf32>, vector<10x8xf32> -> vector<10x8xf32>
    %c0_3 = arith.constant 0 : index
    %c0_4 = arith.constant 0 : index
    %3 = vector.load %arg3[%c0_3, %c0_4] : memref<10x1xf32, #tpu.memory_space<vmem>>, vector<10x1xf32>
    %4 = vector.broadcast %3 : vector<10x1xf32> to vector<10x8xf32>
    %5 = arith.addf %2, %4 : vector<10x8xf32>
    %cst_5 = arith.constant 0.000000e+00 : f32
    %6 = vector.broadcast %cst_5 : f32 to vector<10x8xf32>
    %7 = arith.maximumf %5, %6 : vector<10x8xf32>
    %c0_6 = arith.constant 0 : index
    %c0_7 = arith.constant 0 : index
    %8 = vector.load %arg4[%c0_6, %c0_7] : memref<10x10xf32, #tpu.memory_space<vmem>>, vector<10x10xf32>
    %cst_8 = arith.constant dense<0.000000e+00> : vector<10x8xf32>
    %9 = tpu.matmul %8, %7, %cst_8 {dimension_numbers = #tpu.dot_dimension_numbers<[1], [0], [0], [1], [0, 0, 1, 1], [], []>} : vector<10x10xf32>, vector<10x8xf32>, vector<10x8xf32> -> vector<10x8xf32>
    %c0_9 = arith.constant 0 : index
    %c0_10 = arith.constant 0 : index
    %10 = vector.load %arg5[%c0_9, %c0_10] : memref<10x1xf32, #tpu.memory_space<vmem>>, vector<10x1xf32>
    %11 = vector.broadcast %10 : vector<10x1xf32> to vector<10x8xf32>
    %12 = arith.addf %9, %11 : vector<10x8xf32>
    %c0_11 = arith.constant 0 : index
    %c0_12 = arith.constant 0 : index
    %13 = vector.load %arg6[%c0_11, %c0_12] : memref<10x8xf32, #tpu.memory_space<vmem>>, vector<10x8xf32>
    tpu.vector_store %arg6[%c0_11, %c0_12], %12 {strides = array<i32>} : memref<10x8xf32, #tpu.memory_space<vmem>>, vector<10x8xf32>,
    return
  }
  func.func @transform_0(%arg0: i32) -> (i32, i32) {
    %c0_i32 = arith.constant 0 : i32
    %c0_i32_0 = arith.constant 0 : i32
    return %c0_i32, %arg0 : i32, i32
  }
  func.func @transform_1(%arg0: i32) -> (i32, i32) {
    %c0_i32 = arith.constant 0 : i32
    %c0_i32_0 = arith.constant 0 : i32
    %c0_i32_1 = arith.constant 0 : i32
    return %c0_i32, %c0_i32_0 : i32, i32
  }
  func.func @transform_2(%arg0: i32) -> (i32, i32) {
    %c0_i32 = arith.constant 0 : i32
    %c0_i32_0 = arith.constant 0 : i32
    %c0_i32_1 = arith.constant 0 : i32
    return %c0_i32, %c0_i32_0 : i32, i32
  }
  func.func @transform_3(%arg0: i32) -> (i32, i32) {
    %c0_i32 = arith.constant 0 : i32
    %c0_i32_0 = arith.constant 0 : i32
    %c0_i32_1 = arith.constant 0 : i32
    return %c0_i32, %c0_i32_0 : i32, i32
  }
  func.func @transform_4(%arg0: i32) -> (i32, i32) {
    %c0_i32 = arith.constant 0 : i32
    %c0_i32_0 = arith.constant 0 : i32
    %c0_i32_1 = arith.constant 0 : i32
    return %c0_i32, %c0_i32_0 : i32, i32
  }
  func.func @transform_5(%arg0: i32) -> (i32, i32) {
    %c0_i32 = arith.constant 0 : i32
    %c0_i32_0 = arith.constant 0 : i32
    return %c0_i32, %arg0 : i32, i32
  }
}

</mosaic_0001>

<bundles_post_ra>
// kernel: tpu_custom_call.1
= control target key start
LH: loop header
LB: loop body
LE: loop exit
PB: predicated region body
PF: predicated region fallthrough
CT: control target
= control target key end

     0   :  { %vm43_vm0 = vcmask 1041408   ;;  %vm36_vm1 = vcmask 80896   ;;  %v261_v3 = vmov 0   ;;  %vm224_vm2 = vcmask 58368   ;;  %s336_s0 = inlined_call_operand.vmem [shape: f32[10,8], index: 0, kind: input, shape index: {}]   ;;  %s337_s1 = inlined_call_operand.vmem [shape: f32[10,10], index: 1, kind: input, shape index: {}]   ;;  %s338_s2 = inlined_call_operand.vmem [shape: f32[10,1], index: 2, kind: input, shape index: {}]   ;;  %s339_s3 = inlined_call_operand.vmem [shape: f32[10,10], index: 3, kind: input, shape index: {}]   ;;  %s340_s4 = inlined_call_operand.vmem [shape: f32[10,1], index: 4, kind: input, shape index: {}]   ;;  %s341_s5 = inlined_call_operand.vmem [shape: f32[10,8], index: 5, kind: output, shape index: {}]  }
   0x1   :  { %v21_v0 = vld [vmem:[%s336_s0 + $0x8] sm:$0x3]  ;;  %v20_v1 = vld [vmem:[%s336_s0] sm:$0xff]  ;;  %259 = vset.pattern.permute.xlu0 %v261_v3  ;;  %260 = vset.pattern.permute.xlu1 %v261_v3  ;;  %vm222_vm3 = vcmask 64512  }
   0x2   :  { %v22_v2 = vld [vmem:[%s337_s1] sm:$0xff]  ;;  %244 = vmatprep.subr.msk.mxu0 %vm43_vm0, %v21_v0  ;;  %v25_v4 = vld [vmem:[%s338_s2 + $0x8] sm:$0x3] }
   0x3   :  { %248 = vmatprep.mubr.msk.f32.mxu0 %vm36_vm1, %v22_v2  ;;  %245 = vmatpush3.msk.msra.mxu0 %vm43_vm0, %v21_v0  ;;  %v23_v5 = vld [vmem:[%s337_s1 + $0x8] sm:$0x3]  ;;  %v24_v6 = vld [vmem:[%s338_s2] sm:$0xff] }
   0x4   :  { %33 = vperm.xlu0 %259, %v25_v4   ;;  %246 = vmatprep.subr.mxu0 %v20_v1  ;;  %v124_v7 = vld [vmem:[%s339_s3] sm:$0xff]  ;;  %v127_v9 = vld [vmem:[%s340_s4 + $0x8] sm:$0x3] }
   0x5   :  { %247 = vmatpush3.msra.mxu0 %v20_v1  ;;  %255 = vmatprep.mubr.msk.f32.mxu1 %vm36_vm1, %v124_v7  ;;  %v126_v8 = vld [vmem:[%s340_s4] sm:$0xff]  ;;  %v125_v18 = vld [vmem:[%s339_s3 + $0x8] sm:$0x3] }
   0x6   :  { %249 = vmatmul.mubr.msk.f32.vlgmr.msra.gmra.mxu0 %vm36_vm1, %v23_v5  ;;  %130 = vperm.xlu1 %260, %v126_v8  }
   0x8   :  { %28 = vperm.xlu0 %259, %v24_v6  }
   0xa   :  { %135 = vperm.xlu1 %260, %v127_v9  }
  0x7f   :  { %v34_v10 = vpop.permute.xlu0 %33 }
  0x81   :  { %v131_v19 = vpop.permute.xlu1 %130 }
  0x83   :  { %v29_v13 = vpop.permute.xlu0 %28 }
  0x85   :  { %v136_v20 = vpop.permute.xlu1 %135 }
  0xc6   :  { %v250_v11 = vpop.f32.mrf.mxu0 }
  0xc7   :  { %v119_v12 = vadd.f32 %v250_v11, %v34_v10 }
  0xc8   :  { %v113_v14 = vpop.f32.mrf.mxu0 }
  0xc9   :  { %v123_v15 = vmax.f32 %v119_v12, 0.0  ;;  %v114_v16 = vadd.f32 %v113_v14, %v29_v13 }
  0xcb   :  { %v122_v17 = vmax.f32 %v114_v16, 0.0  ;;  %251 = vmatprep.subr.msk.mxu1 %vm43_vm0, %v123_v15 }
  0xcc   :  { %252 = vmatpush3.msk.msra.mxu1 %vm43_vm0, %v123_v15 }
  0xcd   :  { %253 = vmatprep.subr.mxu1 %v122_v17 }
  0xce   :  { %254 = vmatpush3.msra.mxu1 %v122_v17 }
  0xcf   :  { %256 = vmatmul.mubr.msk.f32.vlgmr.msra.gmra.mxu1 %vm36_vm1, %v125_v18 }
 0x18f   :  { %v257_v21 = vpop.f32.mrf.mxu1 }
 0x190   :  { %v219_v22 = vadd.f32 %v257_v21, %v136_v20 }
 0x191   :  { %v213_v23 = vpop.f32.mrf.mxu1 }
 0x192   :  { %225 = vst.msk [vmem:[%s341_s5 + $0x8] sm:$0x3] %vm224_vm2, %v219_v22  ;;  %v214_v24 = vadd.f32 %v213_v23, %v131_v19 }
 0x194   :  { %223 = vst.msk [vmem:[%s341_s5] sm:$0xff] %vm222_vm3, %v214_v24 }

</bundles_post_ra>
